<compile_context>
chip_gen: v6e
topology: v6e:2x2x1
jax: 0.10.0
libtpu: 0.0.40
codegen_flags: <defaults>
</compile_context>

<pallas_src>
import jax
import jax.numpy as jnp
from jax.experimental import pallas as pl
from jax.experimental.pallas import tpu as pltpu


def _upsample_conv_kernel(x_ref, r_ref, u_ref, wv_ref, bv_ref, o_ref):
    """Fused 2x nearest-upsample + 3x3 'same' conv for one (image, H-tile).

    x_ref : (1, Cin, H+2, W+2)  zero-padded ORIGINAL-resolution image (VMEM)
    r_ref : (3*th2, th+2)       0/1 row-upsample matrix, dy tap folded in (VMEM)
    u_ref : (W+2, 3*Lp)         0/1 col-upsample matrix, dx tap + Cout packing folded in
    wv_ref: (Cin*9, 1, Lp)      per-(ci, dy, dx) conv-weight lane vectors (f32, VMEM)
    bv_ref: (1, Lp)             bias lane vector (f32, VMEM)
    o_ref : (1, th2, Lp)        output tile, channels packed on lanes (lane = co*W2+q)
    """
    cin = x_ref.shape[1]
    _, th2, lanes = o_ref.shape          # lanes == Lp, a multiple of 128
    th = th2 // 2

    t = pl.program_id(1)
    row_start = pl.multiple_of(t * th, th)

    r_all = r_ref[...]                   # (3*th2, th+2)
    u_all = u_ref[...]                   # (W+2, 3*Lp)

    # Bias-initialised f32 accumulator: a single lane-dense (th2, Lp) slab.
    acc = jnp.broadcast_to(bv_ref[...], (th2, lanes)).astype(jnp.float32)

    for ci in range(cin):
        # th+2 original-resolution rows covering this output tile (incl. halo).
        xin = x_ref[0, ci, pl.ds(row_start, th + 2), :]            # (th+2, W+2)
        # Row replication (2x nearest) + dy tap on the MXU (exact 0/1 selection).
        rows_all = jnp.dot(r_all, xin)                             # (3*th2, W+2)
        # Column replication (2x) + dx tap + Cout lane packing on the MXU.
        up_all = jnp.dot(rows_all, u_all,
                         preferred_element_type=jnp.float32)       # (3*th2, 3*Lp)
        for k in range(9):
            dy, dx = k // 3, k % 3
            # Fully aligned static slices: sublane offset dy*th2 (mult of 8),
            # lane offset dx*Lp (mult of 128).
            tap = up_all[dy * th2:(dy + 1) * th2, dx * lanes:(dx + 1) * lanes]
            acc = acc + wv_ref[ci * 9 + k] * tap                   # full-lane VPU FMA

    o_ref[0, :, :] = acc.astype(o_ref.dtype)


def upsample_forward(x_nchw, weight_oihw, bias, *, h_tile=None):
    """Equivalent of Upsample.forward for NCHW input `x_nchw`."""
    n, c, h, w = x_nchw.shape
    h2, w2 = 2 * h, 2 * w
    cout, cin, kh, kw = weight_oihw.shape
    assert (cin, kh, kw) == (c, 3, 3)

    if h_tile is None:
        # Keep h_tile a multiple of 8 (sublane alignment); small tiles also give the
        # grid enough steps per TensorCore at demo sizes.
        h_tile = 8 if h % 8 == 0 else h
    assert h % h_tile == 0
    th, th2 = h_tile, 2 * h_tile

    dt = x_nchw.dtype
    itemsize = jnp.dtype(dt).itemsize

    # Channel-packed lane layout: lane = co*W2 + q, padded up to a multiple of 128.
    lane = cout * w2
    lanes = ((lane + 127) // 128) * 128

    # Only host-side prep: a 1-pixel zero pad at ORIGINAL resolution.
    # Identity: pad1(up2(x))[i, j] == pad1(x)[(i+1)//2, (j+1)//2].
    xp = jnp.pad(x_nchw, ((0, 0), (0, 0), (1, 1), (1, 1)))          # (N, C, H+2, W+2)

    # Row selection matrix with the dy conv tap folded in:
    #   R[dy*th2 + p, r] = 1  iff  r == (p + dy + 1) // 2
    p_idx = jnp.arange(th2)
    dy_idx = jnp.arange(3)
    row_sel = ((dy_idx[:, None] + p_idx[None, :] + 1) // 2).reshape(3 * th2)
    r_all = (row_sel[:, None] == jnp.arange(th + 2)[None, :]).astype(dt)   # (3*th2, th+2)

    # Column selection matrix with the dx conv tap + Cout lane packing folded in:
    #   U[col, dx*Lp + co*w2 + q] = 1  iff  col == (q + dx + 1) // 2
    q_idx = jnp.arange(w2)
    u_all = jnp.zeros((w + 2, 3 * lanes), dt)
    for dx in range(3):
        blk = (jnp.arange(w + 2)[:, None] == ((q_idx + dx + 1) // 2)[None, :]).astype(dt)
        u_all = u_all.at[:, dx * lanes: dx * lanes + lane].set(jnp.tile(blk, (1, cout)))

    # Per-(ci, dy, dx) weight lane vectors (weight constant within each co block).
    w_perm = jnp.transpose(weight_oihw.astype(jnp.float32), (1, 2, 3, 0)).reshape(cin, 9, cout)
    w_lane = jnp.repeat(w_perm, w2, axis=2)                                 # (cin, 9, cout*w2)
    wvec = jnp.zeros((cin, 9, lanes), jnp.float32).at[:, :, :lane].set(w_lane)
    wvec = wvec.reshape(cin * 9, 1, lanes)
    bvec = jnp.zeros((1, lanes), jnp.float32).at[:, :lane].set(
        jnp.repeat(bias.astype(jnp.float32), w2)[None, :])

    grid = (n, h // th)
    steps = n * (h // th)
    flops_per_step = cin * (2 * (3 * th2) * (th + 2) * (w + 2)
                            + 2 * (3 * th2) * (w + 2) * (3 * lanes)
                            + 2 * 9 * th2 * lanes)
    bytes_accessed = int(xp.size * itemsize + r_all.size * itemsize
                         + u_all.size * itemsize + wvec.size * 4 + bvec.size * 4
                         + n * h2 * lanes * itemsize)

    # Explicit VMEM budget (double-buffered operands + live intermediates + headroom).
    block_bytes = (2 * c * (h + 2) * (w + 2) * itemsize        # resident padded image
                   + 2 * 3 * th2 * (th + 2) * itemsize         # R
                   + 2 * (w + 2) * 3 * lanes * itemsize        # U
                   + 2 * cin * 9 * lanes * 4 + 2 * lanes * 4   # weight / bias lane vectors
                   + 2 * th2 * lanes * itemsize                # output block
                   + 6 * 3 * th2 * 3 * lanes * 4)              # live up_all / acc headroom
    vmem_limit = int(min(max(2 * block_bytes, 16 * 1024 * 1024), 48 * 1024 * 1024))

    out = pl.pallas_call(
        _upsample_conv_kernel,
        out_shape=jax.ShapeDtypeStruct((n, h2, lanes), dt),
        grid=grid,
        in_specs=[
            # Full padded image per batch index; constant across the H-tile axis, so
            # the pipeline keeps it resident (no re-DMA per tile).
            pl.BlockSpec((1, c, h + 2, w + 2), lambda i, t: (i, 0, 0, 0)),
            pl.BlockSpec((3 * th2, th + 2), lambda i, t: (0, 0)),
            pl.BlockSpec((w + 2, 3 * lanes), lambda i, t: (0, 0, 0)[:2]),
            pl.BlockSpec((cin * 9, 1, lanes), lambda i, t: (0, 0, 0)),
            pl.BlockSpec((1, lanes), lambda i, t: (0, 0)),
        ],
        out_specs=pl.BlockSpec((1, th2, lanes), lambda i, t: (i, t, 0)),
        compiler_params=pltpu.CompilerParams(
            dimension_semantics=("parallel", "parallel"),
            vmem_limit_bytes=vmem_limit),
        cost_estimate=pl.CostEstimate(flops=steps * flops_per_step,
                                      transcendentals=0,
                                      bytes_accessed=bytes_accessed),
    )(xp, r_all, u_all, wvec, bvec)

    # Un-pack the channel-packed lanes back to NCHW (pure layout plumbing).
    y = out[:, :, :lane].reshape(n, h2, cout, w2)
    return jnp.transpose(y, (0, 2, 1, 3))


def _reference_forward(x_nchw, weight_oihw, bias):
    """Pure-JAX reference (XLA conv) for correctness checking."""
    x_up = jnp.repeat(jnp.repeat(x_nchw, 2, axis=2), 2, axis=3)
    y = jax.lax.conv_general_dilated(
        x_up, weight_oihw, window_strides=(1, 1), padding=((1, 1), (1, 1)),
        dimension_numbers=("NCHW", "OIHW", "NCHW"))
    return y + bias[None, :, None, None]


if __name__ == "__main__":
    key = jax.random.PRNGKey(0)
    kx, kw, kb = jax.random.split(key, 3)

    N, C, H, W = 2, 4, 16, 16
    x = jax.random.normal(kx, (N, C, H, W), dtype=jnp.float32)

    # Deterministic synthetic Conv2d(C, C, 3, padding=1) parameters.
    fan_in = C * 3 * 3
    bound = 1.0 / (fan_in ** 0.5)
    weight = jax.random.uniform(kw, (C, C, 3, 3), jnp.float32, -bound, bound)   # OIHW
    bias = jax.random.uniform(kb, (C,), jnp.float32, -bound, bound)

    fwd = jax.jit(upsample_forward)
    out = jax.block_until_ready(fwd(x, weight, bias))

    ref = _reference_forward(x, weight, bias)
    assert out.shape == (N, C, 2 * H, 2 * W), out.shape
    assert jnp.allclose(out, ref, atol=1e-4, rtol=1e-4), "mismatch vs XLA conv reference"

    print("KERNEL_OK")
</pallas_src>

<mosaic_0001>
module attributes {stable_mosaic.version = 11 : i64} {
  func.func @_upsample_conv_kernel(%arg0: i32, %arg1: i32, %arg2: memref<1x4x18x18xf32, #tpu.memory_space<vmem>>, %arg3: memref<48x10xf32, #tpu.memory_space<vmem>>, %arg4: memref<18x384xf32, #tpu.memory_space<vmem>>, %arg5: memref<36x1x128xf32, #tpu.memory_space<vmem>>, %arg6: memref<1x128xf32, #tpu.memory_space<vmem>>, %arg7: memref<1x16x128xf32, #tpu.memory_space<vmem>>) attributes {dimension_semantics = [#tpu.dimension_semantics<parallel>, #tpu.dimension_semantics<parallel>], iteration_bounds = array<i64: 2, 2>, scalar_prefetch = 0 : i64, scratch_operands = 0 : i64, tpu.core_type = #tpu.core_type<tc>, window_params = [{transform_indices = @transform_0, window_bounds = array<i64: 1, 4, 18, 18>}, {pipeline_mode = #tpu.pipeline_mode<synchronous>, transform_indices = @transform_1, window_bounds = array<i64: 48, 10>}, {pipeline_mode = #tpu.pipeline_mode<synchronous>, transform_indices = @transform_2, window_bounds = array<i64: 18, 384>}, {pipeline_mode = #tpu.pipeline_mode<synchronous>, transform_indices = @transform_3, window_bounds = array<i64: 36, 1, 128>}, {pipeline_mode = #tpu.pipeline_mode<synchronous>, transform_indices = @transform_4, window_bounds = array<i64: 1, 128>}, {transform_indices = @transform_5, window_bounds = array<i64: 1, 16, 128>}]} {
    %c8_i32 = arith.constant 8 : i32
    %0 = arith.muli %arg1, %c8_i32 : i32
    %1 = tpu.assume_multiple %0, 8 : i32
    %c0 = arith.constant 0 : index
    %c0_0 = arith.constant 0 : index
    %2 = vector.load %arg3[%c0, %c0_0] : memref<48x10xf32, #tpu.memory_space<vmem>>, vector<48x10xf32>
    %c0_1 = arith.constant 0 : index
    %c0_2 = arith.constant 0 : index
    %3 = vector.load %arg4[%c0_1, %c0_2] : memref<18x384xf32, #tpu.memory_space<vmem>>, vector<18x384xf32>
    %c0_3 = arith.constant 0 : index
    %c0_4 = arith.constant 0 : index
    %4 = vector.load %arg6[%c0_3, %c0_4] : memref<1x128xf32, #tpu.memory_space<vmem>>, vector<1x128xf32>
    %5 = vector.shape_cast %4 : vector<1x128xf32> to vector<1x128xf32>
    %6 = vector.broadcast %5 : vector<1x128xf32> to vector<16x128xf32>
    %c0_5 = arith.constant 0 : index
    %c0_6 = arith.constant 0 : index
    %7 = arith.index_cast %1 : i32 to index
    %c0_7 = arith.constant 0 : index
    %8 = vector.load %arg2[%c0_5, %c0_6, %7, %c0_7] : memref<1x4x18x18xf32, #tpu.memory_space<vmem>>, vector<1x1x10x18xf32>
    %9 = vector.shape_cast %8 : vector<1x1x10x18xf32> to vector<10x18xf32>
    %cst = arith.constant dense<0.000000e+00> : vector<48x18xf32>
    %10 = tpu.matmul %2, %9, %cst {dimension_numbers = #tpu.dot_dimension_numbers<[1], [0], [0], [1], [0, 0, 1, 1], [], []>} : vector<48x10xf32>, vector<10x18xf32>, vector<48x18xf32> -> vector<48x18xf32>
    %cst_8 = arith.constant dense<0.000000e+00> : vector<48x384xf32>
    %11 = tpu.matmul %10, %3, %cst_8 {dimension_numbers = #tpu.dot_dimension_numbers<[1], [0], [0], [1], [0, 0, 1, 1], [], []>} : vector<48x18xf32>, vector<18x384xf32>, vector<48x384xf32> -> vector<48x384xf32>
    %12 = vector.extract_strided_slice %11 {offsets = [0, 0], sizes = [16, 128], strides = [1, 1]} : vector<48x384xf32> to vector<16x128xf32>
    %c0_9 = arith.constant 0 : index
    %c0_10 = arith.constant 0 : index
    %c0_11 = arith.constant 0 : index
    %13 = vector.load %arg5[%c0_9, %c0_10, %c0_11] : memref<36x1x128xf32, #tpu.memory_space<vmem>>, vector<1x1x128xf32>
    %14 = vector.shape_cast %13 : vector<1x1x128xf32> to vector<1x128xf32>
    %15 = vector.broadcast %14 : vector<1x128xf32> to vector<16x128xf32>
    %16 = arith.mulf %15, %12 : vector<16x128xf32>
    %17 = arith.addf %6, %16 : vector<16x128xf32>
    %18 = vector.extract_strided_slice %11 {offsets = [0, 128], sizes = [16, 128], strides = [1, 1]} : vector<48x384xf32> to vector<16x128xf32>
    %c1 = arith.constant 1 : index
    %c0_12 = arith.constant 0 : index
    %c0_13 = arith.constant 0 : index
    %19 = vector.load %arg5[%c1, %c0_12, %c0_13] : memref<36x1x128xf32, #tpu.memory_space<vmem>>, vector<1x1x128xf32>
    %20 = vector.shape_cast %19 : vector<1x1x128xf32> to vector<1x128xf32>
    %21 = vector.broadcast %20 : vector<1x128xf32> to vector<16x128xf32>
    %22 = arith.mulf %21, %18 : vector<16x128xf32>
    %23 = arith.addf %17, %22 : vector<16x128xf32>
    %24 = vector.extract_strided_slice %11 {offsets = [0, 256], sizes = [16, 128], strides = [1, 1]} : vector<48x384xf32> to vector<16x128xf32>
    %c2 = arith.constant 2 : index
    %c0_14 = arith.constant 0 : index
    %c0_15 = arith.constant 0 : index
    %25 = vector.load %arg5[%c2, %c0_14, %c0_15] : memref<36x1x128xf32, #tpu.memory_space<vmem>>, vector<1x1x128xf32>
    %26 = vector.shape_cast %25 : vector<1x1x128xf32> to vector<1x128xf32>
    %27 = vector.broadcast %26 : vector<1x128xf32> to vector<16x128xf32>
    %28 = arith.mulf %27, %24 : vector<16x128xf32>
    %29 = arith.addf %23, %28 : vector<16x128xf32>
    %30 = vector.extract_strided_slice %11 {offsets = [16, 0], sizes = [16, 128], strides = [1, 1]} : vector<48x384xf32> to vector<16x128xf32>
    %c3 = arith.constant 3 : index
    %c0_16 = arith.constant 0 : index
    %c0_17 = arith.constant 0 : index
    %31 = vector.load %arg5[%c3, %c0_16, %c0_17] : memref<36x1x128xf32, #tpu.memory_space<vmem>>, vector<1x1x128xf32>
    %32 = vector.shape_cast %31 : vector<1x1x128xf32> to vector<1x128xf32>
    %33 = vector.broadcast %32 : vector<1x128xf32> to vector<16x128xf32>
    %34 = arith.mulf %33, %30 : vector<16x128xf32>
    %35 = arith.addf %29, %34 : vector<16x128xf32>
    %36 = vector.extract_strided_slice %11 {offsets = [16, 128], sizes = [16, 128], strides = [1, 1]} : vector<48x384xf32> to vector<16x128xf32>
    %c4 = arith.constant 4 : index
    %c0_18 = arith.constant 0 : index
    %c0_19 = arith.constant 0 : index
    %37 = vector.load %arg5[%c4, %c0_18, %c0_19] : memref<36x1x128xf32, #tpu.memory_space<vmem>>, vector<1x1x128xf32>
    %38 = vector.shape_cast %37 : vector<1x1x128xf32> to vector<1x128xf32>
    %39 = vector.broadcast %38 : vector<1x128xf32> to vector<16x128xf32>
    %40 = arith.mulf %39, %36 : vector<16x128xf32>
    %41 = arith.addf %35, %40 : vector<16x128xf32>
    %42 = vector.extract_strided_slice %11 {offsets = [16, 256], sizes = [16, 128], strides = [1, 1]} : vector<48x384xf32> to vector<16x128xf32>
    %c5 = arith.constant 5 : index
    %c0_20 = arith.constant 0 : index
    %c0_21 = arith.constant 0 : index
    %43 = vector.load %arg5[%c5, %c0_20, %c0_21] : memref<36x1x128xf32, #tpu.memory_space<vmem>>, vector<1x1x128xf32>
    %44 = vector.shape_cast %43 : vector<1x1x128xf32> to vector<1x128xf32>
    %45 = vector.broadcast %44 : vector<1x128xf32> to vector<16x128xf32>
    %46 = arith.mulf %45, %42 : vector<16x128xf32>
    %47 = arith.addf %41, %46 : vector<16x128xf32>
    %48 = vector.extract_strided_slice %11 {offsets = [32, 0], sizes = [16, 128], strides = [1, 1]} : vector<48x384xf32> to vector<16x128xf32>
    %c6 = arith.constant 6 : index
    %c0_22 = arith.constant 0 : index
    %c0_23 = arith.constant 0 : index
    %49 = vector.load %arg5[%c6, %c0_22, %c0_23] : memref<36x1x128xf32, #tpu.memory_space<vmem>>, vector<1x1x128xf32>
    %50 = vector.shape_cast %49 : vector<1x1x128xf32> to vector<1x128xf32>
    %51 = vector.broadcast %50 : vector<1x128xf32> to vector<16x128xf32>
    %52 = arith.mulf %51, %48 : vector<16x128xf32>
    %53 = arith.addf %47, %52 : vector<16x128xf32>
    %54 = vector.extract_strided_slice %11 {offsets = [32, 128], sizes = [16, 128], strides = [1, 1]} : vector<48x384xf32> to vector<16x128xf32>
    %c7 = arith.constant 7 : index
    %c0_24 = arith.constant 0 : index
    %c0_25 = arith.constant 0 : index
    %55 = vector.load %arg5[%c7, %c0_24, %c0_25] : memref<36x1x128xf32, #tpu.memory_space<vmem>>, vector<1x1x128xf32>
    %56 = vector.shape_cast %55 : vector<1x1x128xf32> to vector<1x128xf32>
    %57 = vector.broadcast %56 : vector<1x128xf32> to vector<16x128xf32>
    %58 = arith.mulf %57, %54 : vector<16x128xf32>
    %59 = arith.addf %53, %58 : vector<16x128xf32>
    %60 = vector.extract_strided_slice %11 {offsets = [32, 256], sizes = [16, 128], strides = [1, 1]} : vector<48x384xf32> to vector<16x128xf32>
    %c8 = arith.constant 8 : index
    %c0_26 = arith.constant 0 : index
    %c0_27 = arith.constant 0 : index
    %61 = vector.load %arg5[%c8, %c0_26, %c0_27] : memref<36x1x128xf32, #tpu.memory_space<vmem>>, vector<1x1x128xf32>
    %62 = vector.shape_cast %61 : vector<1x1x128xf32> to vector<1x128xf32>
    %63 = vector.broadcast %62 : vector<1x128xf32> to vector<16x128xf32>
    %64 = arith.mulf %63, %60 : vector<16x128xf32>
    %65 = arith.addf %59, %64 : vector<16x128xf32>
    %c0_28 = arith.constant 0 : index
    %c1_29 = arith.constant 1 : index
    %66 = arith.index_cast %1 : i32 to index
    %c0_30 = arith.constant 0 : index
    %67 = vector.load %arg2[%c0_28, %c1_29, %66, %c0_30] : memref<1x4x18x18xf32, #tpu.memory_space<vmem>>, vector<1x1x10x18xf32>
    %68 = vector.shape_cast %67 : vector<1x1x10x18xf32> to vector<10x18xf32>
    %cst_31 = arith.constant dense<0.000000e+00> : vector<48x18xf32>
    %69 = tpu.matmul %2, %68, %cst_31 {dimension_numbers = #tpu.dot_dimension_numbers<[1], [0], [0], [1], [0, 0, 1, 1], [], []>} : vector<48x10xf32>, vector<10x18xf32>, vector<48x18xf32> -> vector<48x18xf32>
    %cst_32 = arith.constant dense<0.000000e+00> : vector<48x384xf32>
    %70 = tpu.matmul %69, %3, %cst_32 {dimension_numbers = #tpu.dot_dimension_numbers<[1], [0], [0], [1], [0, 0, 1, 1], [], []>} : vector<48x18xf32>, vector<18x384xf32>, vector<48x384xf32> -> vector<48x384xf32>
    %71 = vector.extract_strided_slice %70 {offsets = [0, 0], sizes = [16, 128], strides = [1, 1]} : vector<48x384xf32> to vector<16x128xf32>
    %c9 = arith.constant 9 : index
    %c0_33 = arith.constant 0 : index
    %c0_34 = arith.constant 0 : index
    %72 = vector.load %arg5[%c9, %c0_33, %c0_34] : memref<36x1x128xf32, #tpu.memory_space<vmem>>, vector<1x1x128xf32>
    %73 = vector.shape_cast %72 : vector<1x1x128xf32> to vector<1x128xf32>
    %74 = vector.broadcast %73 : vector<1x128xf32> to vector<16x128xf32>
    %75 = arith.mulf %74, %71 : vector<16x128xf32>
    %76 = arith.addf %65, %75 : vector<16x128xf32>
    %77 = vector.extract_strided_slice %70 {offsets = [0, 128], sizes = [16, 128], strides = [1, 1]} : vector<48x384xf32> to vector<16x128xf32>
    %c10 = arith.constant 10 : index
    %c0_35 = arith.constant 0 : index
    %c0_36 = arith.constant 0 : index
    %78 = vector.load %arg5[%c10, %c0_35, %c0_36] : memref<36x1x128xf32, #tpu.memory_space<vmem>>, vector<1x1x128xf32>
    %79 = vector.shape_cast %78 : vector<1x1x128xf32> to vector<1x128xf32>
    %80 = vector.broadcast %79 : vector<1x128xf32> to vector<16x128xf32>
    %81 = arith.mulf %80, %77 : vector<16x128xf32>
    %82 = arith.addf %76, %81 : vector<16x128xf32>
    %83 = vector.extract_strided_slice %70 {offsets = [0, 256], sizes = [16, 128], strides = [1, 1]} : vector<48x384xf32> to vector<16x128xf32>
    %c11 = arith.constant 11 : index
    %c0_37 = arith.constant 0 : index
    %c0_38 = arith.constant 0 : index
    %84 = vector.load %arg5[%c11, %c0_37, %c0_38] : memref<36x1x128xf32, #tpu.memory_space<vmem>>, vector<1x1x128xf32>
    %85 = vector.shape_cast %84 : vector<1x1x128xf32> to vector<1x128xf32>
    %86 = vector.broadcast %85 : vector<1x128xf32> to vector<16x128xf32>
    %87 = arith.mulf %86, %83 : vector<16x128xf32>
    %88 = arith.addf %82, %87 : vector<16x128xf32>
    %89 = vector.extract_strided_slice %70 {offsets = [16, 0], sizes = [16, 128], strides = [1, 1]} : vector<48x384xf32> to vector<16x128xf32>
    %c12 = arith.constant 12 : index
    %c0_39 = arith.constant 0 : index
    %c0_40 = arith.constant 0 : index
    %90 = vector.load %arg5[%c12, %c0_39, %c0_40] : memref<36x1x128xf32, #tpu.memory_space<vmem>>, vector<1x1x128xf32>
    %91 = vector.shape_cast %90 : vector<1x1x128xf32> to vector<1x128xf32>
    %92 = vector.broadcast %91 : vector<1x128xf32> to vector<16x128xf32>
    %93 = arith.mulf %92, %89 : vector<16x128xf32>
    %94 = arith.addf %88, %93 : vector<16x128xf32>
    %95 = vector.extract_strided_slice %70 {offsets = [16, 128], sizes = [16, 128], strides = [1, 1]} : vector<48x384xf32> to vector<16x128xf32>
    %c13 = arith.constant 13 : index
    %c0_41 = arith.constant 0 : index
    %c0_42 = arith.constant 0 : index
    %96 = vector.load %arg5[%c13, %c0_41, %c0_42] : memref<36x1x128xf32, #tpu.memory_space<vmem>>, vector<1x1x128xf32>
    %97 = vector.shape_cast %96 : vector<1x1x128xf32> to vector<1x128xf32>
    %98 = vector.broadcast %97 : vector<1x128xf32> to vector<16x128xf32>
    %99 = arith.mulf %98, %95 : vector<16x128xf32>
    %100 = arith.addf %94, %99 : vector<16x128xf32>
    %101 = vector.extract_strided_slice %70 {offsets = [16, 256], sizes = [16, 128], strides = [1, 1]} : vector<48x384xf32> to vector<16x128xf32>
    %c14 = arith.constant 14 : index
    %c0_43 = arith.constant 0 : index
    %c0_44 = arith.constant 0 : index
    %102 = vector.load %arg5[%c14, %c0_43, %c0_44] : memref<36x1x128xf32, #tpu.memory_space<vmem>>, vector<1x1x128xf32>
    %103 = vector.shape_cast %102 : vector<1x1x128xf32> to vector<1x128xf32>
    %104 = vector.broadcast %103 : vector<1x128xf32> to vector<16x128xf32>
    %105 = arith.mulf %104, %101 : vector<16x128xf32>
    %106 = arith.addf %100, %105 : vector<16x128xf32>
    %107 = vector.extract_strided_slice %70 {offsets = [32, 0], sizes = [16, 128], strides = [1, 1]} : vector<48x384xf32> to vector<16x128xf32>
    %c15 = arith.constant 15 : index
    %c0_45 = arith.constant 0 : index
    %c0_46 = arith.constant 0 : index
    %108 = vector.load %arg5[%c15, %c0_45, %c0_46] : memref<36x1x128xf32, #tpu.memory_space<vmem>>, vector<1x1x128xf32>
    %109 = vector.shape_cast %108 : vector<1x1x128xf32> to vector<1x128xf32>
    %110 = vector.broadcast %109 : vector<1x128xf32> to vector<16x128xf32>
    %111 = arith.mulf %110, %107 : vector<16x128xf32>
    %112 = arith.addf %106, %111 : vector<16x128xf32>
    %113 = vector.extract_strided_slice %70 {offsets = [32, 128], sizes = [16, 128], strides = [1, 1]} : vector<48x384xf32> to vector<16x128xf32>
    %c16 = arith.constant 16 : index
    %c0_47 = arith.constant 0 : index
    %c0_48 = arith.constant 0 : index
    %114 = vector.load %arg5[%c16, %c0_47, %c0_48] : memref<36x1x128xf32, #tpu.memory_space<vmem>>, vector<1x1x128xf32>
    %115 = vector.shape_cast %114 : vector<1x1x128xf32> to vector<1x128xf32>
    %116 = vector.broadcast %115 : vector<1x128xf32> to vector<16x128xf32>
    %117 = arith.mulf %116, %113 : vector<16x128xf32>
    %118 = arith.addf %112, %117 : vector<16x128xf32>
    %119 = vector.extract_strided_slice %70 {offsets = [32, 256], sizes = [16, 128], strides = [1, 1]} : vector<48x384xf32> to vector<16x128xf32>
    %c17 = arith.constant 17 : index
    %c0_49 = arith.constant 0 : index
    %c0_50 = arith.constant 0 : index
    %120 = vector.load %arg5[%c17, %c0_49, %c0_50] : memref<36x1x128xf32, #tpu.memory_space<vmem>>, vector<1x1x128xf32>
    %121 = vector.shape_cast %120 : vector<1x1x128xf32> to vector<1x128xf32>
    %122 = vector.broadcast %121 : vector<1x128xf32> to vector<16x128xf32>
    %123 = arith.mulf %122, %119 : vector<16x128xf32>
    %124 = arith.addf %118, %123 : vector<16x128xf32>
    %c0_51 = arith.constant 0 : index
    %c2_52 = arith.constant 2 : index
    %125 = arith.index_cast %1 : i32 to index
    %c0_53 = arith.constant 0 : index
    %126 = vector.load %arg2[%c0_51, %c2_52, %125, %c0_53] : memref<1x4x18x18xf32, #tpu.memory_space<vmem>>, vector<1x1x10x18xf32>
    %127 = vector.shape_cast %126 : vector<1x1x10x18xf32> to vector<10x18xf32>
    %cst_54 = arith.constant dense<0.000000e+00> : vector<48x18xf32>
    %128 = tpu.matmul %2, %127, %cst_54 {dimension_numbers = #tpu.dot_dimension_numbers<[1], [0], [0], [1], [0, 0, 1, 1], [], []>} : vector<48x10xf32>, vector<10x18xf32>, vector<48x18xf32> -> vector<48x18xf32>
    %cst_55 = arith.constant dense<0.000000e+00> : vector<48x384xf32>
    %129 = tpu.matmul %128, %3, %cst_55 {dimension_numbers = #tpu.dot_dimension_numbers<[1], [0], [0], [1], [0, 0, 1, 1], [], []>} : vector<48x18xf32>, vector<18x384xf32>, vector<48x384xf32> -> vector<48x384xf32>
    %130 = vector.extract_strided_slice %129 {offsets = [0, 0], sizes = [16, 128], strides = [1, 1]} : vector<48x384xf32> to vector<16x128xf32>
    %c18 = arith.constant 18 : index
    %c0_56 = arith.constant 0 : index
    %c0_57 = arith.constant 0 : index
    %131 = vector.load %arg5[%c18, %c0_56, %c0_57] : memref<36x1x128xf32, #tpu.memory_space<vmem>>, vector<1x1x128xf32>
    %132 = vector.shape_cast %131 : vector<1x1x128xf32> to vector<1x128xf32>
    %133 = vector.broadcast %132 : vector<1x128xf32> to vector<16x128xf32>
    %134 = arith.mulf %133, %130 : vector<16x128xf32>
    %135 = arith.addf %124, %134 : vector<16x128xf32>
    %136 = vector.extract_strided_slice %129 {offsets = [0, 128], sizes = [16, 128], strides = [1, 1]} : vector<48x384xf32> to vector<16x128xf32>
    %c19 = arith.constant 19 : index
    %c0_58 = arith.constant 0 : index
    %c0_59 = arith.constant 0 : index
    %137 = vector.load %arg5[%c19, %c0_58, %c0_59] : memref<36x1x128xf32, #tpu.memory_space<vmem>>, vector<1x1x128xf32>
    %138 = vector.shape_cast %137 : vector<1x1x128xf32> to vector<1x128xf32>
    %139 = vector.broadcast %138 : vector<1x128xf32> to vector<16x128xf32>
    %140 = arith.mulf %139, %136 : vector<16x128xf32>
    %141 = arith.addf %135, %140 : vector<16x128xf32>
    %142 = vector.extract_strided_slice %129 {offsets = [0, 256], sizes = [16, 128], strides = [1, 1]} : vector<48x384xf32> to vector<16x128xf32>
    %c20 = arith.constant 20 : index
    %c0_60 = arith.constant 0 : index
    %c0_61 = arith.constant 0 : index
    %143 = vector.load %arg5[%c20, %c0_60, %c0_61] : memref<36x1x128xf32, #tpu.memory_space<vmem>>, vector<1x1x128xf32>
    %144 = vector.shape_cast %143 : vector<1x1x128xf32> to vector<1x128xf32>
    %145 = vector.broadcast %144 : vector<1x128xf32> to vector<16x128xf32>
    %146 = arith.mulf %145, %142 : vector<16x128xf32>
    %147 = arith.addf %141, %146 : vector<16x128xf32>
    %148 = vector.extract_strided_slice %129 {offsets = [16, 0], sizes = [16, 128], strides = [1, 1]} : vector<48x384xf32> to vector<16x128xf32>
    %c21 = arith.constant 21 : index
    %c0_62 = arith.constant 0 : index
    %c0_63 = arith.constant 0 : index
    %149 = vector.load %arg5[%c21, %c0_62, %c0_63] : memref<36x1x128xf32, #tpu.memory_space<vmem>>, vector<1x1x128xf32>
    %150 = vector.shape_cast %149 : vector<1x1x128xf32> to vector<1x128xf32>
    %151 = vector.broadcast %150 : vector<1x128xf32> to vector<16x128xf32>
    %152 = arith.mulf %151, %148 : vector<16x128xf32>
    %153 = arith.addf %147, %152 : vector<16x128xf32>
    %154 = vector.extract_strided_slice %129 {offsets = [16, 128], sizes = [16, 128], strides = [1, 1]} : vector<48x384xf32> to vector<16x128xf32>
    %c22 = arith.constant 22 : index
    %c0_64 = arith.constant 0 : index
    %c0_65 = arith.constant 0 : index
    %155 = vector.load %arg5[%c22, %c0_64, %c0_65] : memref<36x1x128xf32, #tpu.memory_space<vmem>>, vector<1x1x128xf32>
    %156 = vector.shape_cast %155 : vector<1x1x128xf32> to vector<1x128xf32>
    %157 = vector.broadcast %156 : vector<1x128xf32> to vector<16x128xf32>
    %158 = arith.mulf %157, %154 : vector<16x128xf32>
    %159 = arith.addf %153, %158 : vector<16x128xf32>
    %160 = vector.extract_strided_slice %129 {offsets = [16, 256], sizes = [16, 128], strides = [1, 1]} : vector<48x384xf32> to vector<16x128xf32>
    %c23 = arith.constant 23 : index
    %c0_66 = arith.constant 0 : index
    %c0_67 = arith.constant 0 : index
    %161 = vector.load %arg5[%c23, %c0_66, %c0_67] : memref<36x1x128xf32, #tpu.memory_space<vmem>>, vector<1x1x128xf32>
    %162 = vector.shape_cast %161 : vector<1x1x128xf32> to vector<1x128xf32>
    %163 = vector.broadcast %162 : vector<1x128xf32> to vector<16x128xf32>
    %164 = arith.mulf %163, %160 : vector<16x128xf32>
    %165 = arith.addf %159, %164 : vector<16x128xf32>
    %166 = vector.extract_strided_slice %129 {offsets = [32, 0], sizes = [16, 128], strides = [1, 1]} : vector<48x384xf32> to vector<16x128xf32>
    %c24 = arith.constant 24 : index
    %c0_68 = arith.constant 0 : index
    %c0_69 = arith.constant 0 : index
    %167 = vector.load %arg5[%c24, %c0_68, %c0_69] : memref<36x1x128xf32, #tpu.memory_space<vmem>>, vector<1x1x128xf32>
    %168 = vector.shape_cast %167 : vector<1x1x128xf32> to vector<1x128xf32>
    %169 = vector.broadcast %168 : vector<1x128xf32> to vector<16x128xf32>
    %170 = arith.mulf %169, %166 : vector<16x128xf32>
    %171 = arith.addf %165, %170 : vector<16x128xf32>
    %172 = vector.extract_strided_slice %129 {offsets = [32, 128], sizes = [16, 128], strides = [1, 1]} : vector<48x384xf32> to vector<16x128xf32>
    %c25 = arith.constant 25 : index
    %c0_70 = arith.constant 0 : index
    %c0_71 = arith.constant 0 : index
    %173 = vector.load %arg5[%c25, %c0_70, %c0_71] : memref<36x1x128xf32, #tpu.memory_space<vmem>>, vector<1x1x128xf32>
    %174 = vector.shape_cast %173 : vector<1x1x128xf32> to vector<1x128xf32>
    %175 = vector.broadcast %174 : vector<1x128xf32> to vector<16x128xf32>
    %176 = arith.mulf %175, %172 : vector<16x128xf32>
    %177 = arith.addf %171, %176 : vector<16x128xf32>
    %178 = vector.extract_strided_slice %129 {offsets = [32, 256], sizes = [16, 128], strides = [1, 1]} : vector<48x384xf32> to vector<16x128xf32>
    %c26 = arith.constant 26 : index
    %c0_72 = arith.constant 0 : index
    %c0_73 = arith.constant 0 : index
    %179 = vector.load %arg5[%c26, %c0_72, %c0_73] : memref<36x1x128xf32, #tpu.memory_space<vmem>>, vector<1x1x128xf32>
    %180 = vector.shape_cast %179 : vector<1x1x128xf32> to vector<1x128xf32>
    %181 = vector.broadcast %180 : vector<1x128xf32> to vector<16x128xf32>
    %182 = arith.mulf %181, %178 : vector<16x128xf32>
    %183 = arith.addf %177, %182 : vector<16x128xf32>
    %c0_74 = arith.constant 0 : index
    %c3_75 = arith.constant 3 : index
    %184 = arith.index_cast %1 : i32 to index
    %c0_76 = arith.constant 0 : index
    %185 = vector.load %arg2[%c0_74, %c3_75, %184, %c0_76] : memref<1x4x18x18xf32, #tpu.memory_space<vmem>>, vector<1x1x10x18xf32>
    %186 = vector.shape_cast %185 : vector<1x1x10x18xf32> to vector<10x18xf32>
    %cst_77 = arith.constant dense<0.000000e+00> : vector<48x18xf32>
    %187 = tpu.matmul %2, %186, %cst_77 {dimension_numbers = #tpu.dot_dimension_numbers<[1], [0], [0], [1], [0, 0, 1, 1], [], []>} : vector<48x10xf32>, vector<10x18xf32>, vector<48x18xf32> -> vector<48x18xf32>
    %cst_78 = arith.constant dense<0.000000e+00> : vector<48x384xf32>
    %188 = tpu.matmul %187, %3, %cst_78 {dimension_numbers = #tpu.dot_dimension_numbers<[1], [0], [0], [1], [0, 0, 1, 1], [], []>} : vector<48x18xf32>, vector<18x384xf32>, vector<48x384xf32> -> vector<48x384xf32>
    %189 = vector.extract_strided_slice %188 {offsets = [0, 0], sizes = [16, 128], strides = [1, 1]} : vector<48x384xf32> to vector<16x128xf32>
    %c27 = arith.constant 27 : index
    %c0_79 = arith.constant 0 : index
    %c0_80 = arith.constant 0 : index
    %190 = vector.load %arg5[%c27, %c0_79, %c0_80] : memref<36x1x128xf32, #tpu.memory_space<vmem>>, vector<1x1x128xf32>
    %191 = vector.shape_cast %190 : vector<1x1x128xf32> to vector<1x128xf32>
    %192 = vector.broadcast %191 : vector<1x128xf32> to vector<16x128xf32>
    %193 = arith.mulf %192, %189 : vector<16x128xf32>
    %194 = arith.addf %183, %193 : vector<16x128xf32>
    %195 = vector.extract_strided_slice %188 {offsets = [0, 128], sizes = [16, 128], strides = [1, 1]} : vector<48x384xf32> to vector<16x128xf32>
    %c28 = arith.constant 28 : index
    %c0_81 = arith.constant 0 : index
    %c0_82 = arith.constant 0 : index
    %196 = vector.load %arg5[%c28, %c0_81, %c0_82] : memref<36x1x128xf32, #tpu.memory_space<vmem>>, vector<1x1x128xf32>
    %197 = vector.shape_cast %196 : vector<1x1x128xf32> to vector<1x128xf32>
    %198 = vector.broadcast %197 : vector<1x128xf32> to vector<16x128xf32>
    %199 = arith.mulf %198, %195 : vector<16x128xf32>
    %200 = arith.addf %194, %199 : vector<16x128xf32>
    %201 = vector.extract_strided_slice %188 {offsets = [0, 256], sizes = [16, 128], strides = [1, 1]} : vector<48x384xf32> to vector<16x128xf32>
    %c29 = arith.constant 29 : index
    %c0_83 = arith.constant 0 : index
    %c0_84 = arith.constant 0 : index
    %202 = vector.load %arg5[%c29, %c0_83, %c0_84] : memref<36x1x128xf32, #tpu.memory_space<vmem>>, vector<1x1x128xf32>
    %203 = vector.shape_cast %202 : vector<1x1x128xf32> to vector<1x128xf32>
    %204 = vector.broadcast %203 : vector<1x128xf32> to vector<16x128xf32>
    %205 = arith.mulf %204, %201 : vector<16x128xf32>
    %206 = arith.addf %200, %205 : vector<16x128xf32>
    %207 = vector.extract_strided_slice %188 {offsets = [16, 0], sizes = [16, 128], strides = [1, 1]} : vector<48x384xf32> to vector<16x128xf32>
    %c30 = arith.constant 30 : index
    %c0_85 = arith.constant 0 : index
    %c0_86 = arith.constant 0 : index
    %208 = vector.load %arg5[%c30, %c0_85, %c0_86] : memref<36x1x128xf32, #tpu.memory_space<vmem>>, vector<1x1x128xf32>
    %209 = vector.shape_cast %208 : vector<1x1x128xf32> to vector<1x128xf32>
    %210 = vector.broadcast %209 : vector<1x128xf32> to vector<16x128xf32>
    %211 = arith.mulf %210, %207 : vector<16x128xf32>
    %212 = arith.addf %206, %211 : vector<16x128xf32>
    %213 = vector.extract_strided_slice %188 {offsets = [16, 128], sizes = [16, 128], strides = [1, 1]} : vector<48x384xf32> to vector<16x128xf32>
    %c31 = arith.constant 31 : index
    %c0_87 = arith.constant 0 : index
    %c0_88 = arith.constant 0 : index
    %214 = vector.load %arg5[%c31, %c0_87, %c0_88] : memref<36x1x128xf32, #tpu.memory_space<vmem>>, vector<1x1x128xf32>
    %215 = vector.shape_cast %214 : vector<1x1x128xf32> to vector<1x128xf32>
    %216 = vector.broadcast %215 : vector<1x128xf32> to vector<16x128xf32>
    %217 = arith.mulf %216, %213 : vector<16x128xf32>
    %218 = arith.addf %212, %217 : vector<16x128xf32>
    %219 = vector.extract_strided_slice %188 {offsets = [16, 256], sizes = [16, 128], strides = [1, 1]} : vector<48x384xf32> to vector<16x128xf32>
    %c32 = arith.constant 32 : index
    %c0_89 = arith.constant 0 : index
    %c0_90 = arith.constant 0 : index
    %220 = vector.load %arg5[%c32, %c0_89, %c0_90] : memref<36x1x128xf32, #tpu.memory_space<vmem>>, vector<1x1x128xf32>
    %221 = vector.shape_cast %220 : vector<1x1x128xf32> to vector<1x128xf32>
    %222 = vector.broadcast %221 : vector<1x128xf32> to vector<16x128xf32>
    %223 = arith.mulf %222, %219 : vector<16x128xf32>
    %224 = arith.addf %218, %223 : vector<16x128xf32>
    %225 = vector.extract_strided_slice %188 {offsets = [32, 0], sizes = [16, 128], strides = [1, 1]} : vector<48x384xf32> to vector<16x128xf32>
    %c33 = arith.constant 33 : index
    %c0_91 = arith.constant 0 : index
    %c0_92 = arith.constant 0 : index
    %226 = vector.load %arg5[%c33, %c0_91, %c0_92] : memref<36x1x128xf32, #tpu.memory_space<vmem>>, vector<1x1x128xf32>
    %227 = vector.shape_cast %226 : vector<1x1x128xf32> to vector<1x128xf32>
    %228 = vector.broadcast %227 : vector<1x128xf32> to vector<16x128xf32>
    %229 = arith.mulf %228, %225 : vector<16x128xf32>
    %230 = arith.addf %224, %229 : vector<16x128xf32>
    %231 = vector.extract_strided_slice %188 {offsets = [32, 128], sizes = [16, 128], strides = [1, 1]} : vector<48x384xf32> to vector<16x128xf32>
    %c34 = arith.constant 34 : index
    %c0_93 = arith.constant 0 : index
    %c0_94 = arith.constant 0 : index
    %232 = vector.load %arg5[%c34, %c0_93, %c0_94] : memref<36x1x128xf32, #tpu.memory_space<vmem>>, vector<1x1x128xf32>
    %233 = vector.shape_cast %232 : vector<1x1x128xf32> to vector<1x128xf32>
    %234 = vector.broadcast %233 : vector<1x128xf32> to vector<16x128xf32>
    %235 = arith.mulf %234, %231 : vector<16x128xf32>
    %236 = arith.addf %230, %235 : vector<16x128xf32>
    %237 = vector.extract_strided_slice %188 {offsets = [32, 256], sizes = [16, 128], strides = [1, 1]} : vector<48x384xf32> to vector<16x128xf32>
    %c35 = arith.constant 35 : index
    %c0_95 = arith.constant 0 : index
    %c0_96 = arith.constant 0 : index
    %238 = vector.load %arg5[%c35, %c0_95, %c0_96] : memref<36x1x128xf32, #tpu.memory_space<vmem>>, vector<1x1x128xf32>
    %239 = vector.shape_cast %238 : vector<1x1x128xf32> to vector<1x128xf32>
    %240 = vector.broadcast %239 : vector<1x128xf32> to vector<16x128xf32>
    %241 = arith.mulf %240, %237 : vector<16x128xf32>
    %242 = arith.addf %236, %241 : vector<16x128xf32>
    %c0_97 = arith.constant 0 : index
    %c0_98 = arith.constant 0 : index
    %c0_99 = arith.constant 0 : index
    %243 = vector.load %arg7[%c0_97, %c0_98, %c0_99] : memref<1x16x128xf32, #tpu.memory_space<vmem>>, vector<1x16x128xf32>
    %244 = vector.shape_cast %243 : vector<1x16x128xf32> to vector<16x128xf32>
    %245 = vector.shape_cast %242 : vector<16x128xf32> to vector<1x16x128xf32>
    tpu.vector_store %arg7[%c0_97, %c0_98, %c0_99], %245 {strides = array<i32>} : memref<1x16x128xf32, #tpu.memory_space<vmem>>, vector<1x16x128xf32>,
    return
  }
  func.func @transform_0(%arg0: i32, %arg1: i32) -> (i32, i32, i32, i32) {
    %c0_i32 = arith.constant 0 : i32
    %c0_i32_0 = arith.constant 0 : i32
    %c0_i32_1 = arith.constant 0 : i32
    %c0_i32_2 = arith.constant 0 : i32
    return %arg0, %c0_i32, %c0_i32_0, %c0_i32_1 : i32, i32, i32, i32
  }
  func.func @transform_1(%arg0: i32, %arg1: i32) -> (i32, i32) {
    %c0_i32 = arith.constant 0 : i32
    %c0_i32_0 = arith.constant 0 : i32
    %c0_i32_1 = arith.constant 0 : i32
    return %c0_i32, %c0_i32_0 : i32, i32
  }
  func.func @transform_2(%arg0: i32, %arg1: i32) -> (i32, i32) {
    %c0_i32 = arith.constant 0 : i32
    %c0_i32_0 = arith.constant 0 : i32
    %c0_i32_1 = arith.constant 0 : i32
    return %c0_i32, %c0_i32_0 : i32, i32
  }
  func.func @transform_3(%arg0: i32, %arg1: i32) -> (i32, i32, i32) {
    %c0_i32 = arith.constant 0 : i32
    %c0_i32_0 = arith.constant 0 : i32
    %c0_i32_1 = arith.constant 0 : i32
    %c0_i32_2 = arith.constant 0 : i32
    return %c0_i32, %c0_i32_0, %c0_i32_1 : i32, i32, i32
  }
  func.func @transform_4(%arg0: i32, %arg1: i32) -> (i32, i32) {
    %c0_i32 = arith.constant 0 : i32
    %c0_i32_0 = arith.constant 0 : i32
    %c0_i32_1 = arith.constant 0 : i32
    return %c0_i32, %c0_i32_0 : i32, i32
  }
  func.func @transform_5(%arg0: i32, %arg1: i32) -> (i32, i32, i32) {
    %c0_i32 = arith.constant 0 : i32
    %c0_i32_0 = arith.constant 0 : i32
    return %arg0, %arg1, %c0_i32 : i32, i32, i32
  }
}

</mosaic_0001>

<bundles_post_ra>
// kernel: upsample_forward.1
= control target key start
LH: loop header
LB: loop body
LE: loop exit
PB: predicated region body
PF: predicated region fallthrough
CT: control target
= control target key end

     0   :  { %s2566_s18 = smov 0   ;;  %s2568_s19 = smov 0   ;;  %s3013_s0 = inlined_call_operand.vmem [shape: f32[2,4,18,18], index: 0, kind: input, shape index: {}]   ;;  %s3014_s1 = inlined_call_operand.vmem [shape: f32[48,10], index: 1, kind: input, shape index: {}]   ;;  %s3015_s2 = inlined_call_operand.vmem [shape: f32[18,384], index: 2, kind: input, shape index: {}]   ;;  %s3016_s3 = inlined_call_operand.vmem [shape: f32[36,1,128], index: 3, kind: input, shape index: {}]   ;;  %s3017_s4 = inlined_call_operand.vmem [shape: f32[1,128], index: 4, kind: input, shape index: {}]   ;;  %s3018_s5 = inlined_call_operand.vmem [shape: f32[2,32,128], index: 5, kind: output, shape index: {}]  }
   0x1   :  { %s2570_s20 = smov 0   ;;  %s2572_s21 = smov 0  }
   0x2   :  { %s2574_s22 = smov 0  }
   0x3 LB: > { %s24_s23 = sadd.s32 1, %s2525_s20  ;;  %s27_s24 = sadd.s32 1, %s2529_s21  ;;  %s2533_s22 = sphi %s2574_s22, %s15_s22   ;;  %s2529_s21 = sphi %s2572_s21, %s3022_s21   ;;  %s2525_s20 = sphi %s2570_s20, %s3021_s20   ;;  %s2521_s19 = sphi %s2568_s19, %s3020_s19   ;;  %s2517_s18 = sphi %s2566_s18, %s3019_s18  }
   0x4   : > { %p25_p0 = scmp.ge.s32.totalorder %s24_s23, 2  ;;  %p2096_p1 = scmp.ge.s32.totalorder %s2533_s22, 1 }
   0x5   : > { %p201_p2 = scmp.lt.s32.totalorder %s2533_s22, 5 }
   0x6   : > { %s3024_s23 = smov (%p25_p0, %s24_s23), 0  ;;  %s3026_s24 = smov (!%p25_p0, %s27_s24), %s2529_s21 }
   0x7   : > { %p202_p3 = pnand %p2096_p1, %p201_p2  ;;  %p29_p4 = scmp.ge.s32.totalorder %s3026_s24, 2 }
   0x8   : > { %p233_p5 = scmp.lt.s32.totalorder (!%p202_p3), %s2521_s19, 1  ;;  %s2101_s9 = sshll.u32 (!%p202_p3), %s2517_s18, 3 }
   0x9   : > { %s3028_s24 = smov (%p29_p4, %s3026_s24), 0  ;;  %205 = sbr.rel (%p202_p3) target bundleno = 1065 (0x429), region = 40 }
   0xa   : > { %s2098_s10 = sshll.u32 (!%p202_p3), %s2517_s18, 1 }
   0xb   : > { %p241_p6 = scmp.lt.s32.totalorder (!%p202_p3), %s2098_s10, 3 }
   0xe   : > { %v2601_v0 = vld [vmem:[%s3014_s1] sm:$0xff]  ;;  %vm274_vm0 = vcmask 80896   ;;  %s3030_s19 = smov (!%p233_p5, %s2521_s19), 1  ;;  %vm293_vm1 = vcmask 1041408   ;;  %v2610_v1 = vld [vmem:[%s3015_s2 + $0x38] sm:$0x3] }
   0xf   : > { %2345 = vmatprep.mubr.msk.f32.mxu0 %vm274_vm0, %v2601_v0  ;;  %v2615_v2 = vld [vmem:[%s3015_s2 + $0x30] sm:$0x3]  ;;  %v2620_v3 = vld [vmem:[%s3015_s2 + $0x20] sm:$0xff]  ;;  %s2453_s8 = smul.u32 96, %s3030_s19  ;;  %2110 = vmatprep.subr.msk.mxu1 %vm293_vm1, %v2610_v1  ;;  %v2641_v6 = vld [vmem:[%s3014_s1 + $0x8] sm:$0xff]  ;;  %v2535_v17 = vmov 0.0  }
  0x10   : > { %2111 = vmatpush1.msk.msra.mxu1 %vm293_vm1, %v2615_v2  ;;  %v2646_v7 = vld [vmem:[%s3015_s2 + $0x40] sm:$0x3]  ;;  %v2651_v8 = vld [vmem:[%s3014_s1 + $0x10] sm:$0xff]  ;;  %v2656_v9 = vld [vmem:[%s3015_s2 + $0x28] sm:$0xff]  ;;  %484 = vmatprep.mubr.f32.mxu1 %v2535_v17  ;;  %vm392_vm2 = vcmask 146432   ;;  %s3032_s10 = smov (!%p241_p6, %s2098_s10), 3 }
  0x11   : > { %s237_s12 = scalar_lea.vmem %s3013_s0, %s2453_s8  ;;  %448 = vmatprep.subr.mxu1 %v2620_v3  ;;  %v2667_v10 = vld [vmem:[%s3014_s1 + $0x18] sm:$0xff]  ;;  %v2674_v11 = vld [vmem:[%s3015_s2 + $0x10] sm:$0xff]  ;;  %v2679_v12 = vld [vmem:[%s3014_s1 + $0x20] sm:$0xff]  ;;  %s2099_s17 = sshll.u32 %s3030_s19, 2 }
  0x12   : > { %s2632_s13 = scalar_lea.vmem %s237_s12, %s2101_s9  ;;  %v2691_v13 = vld [vmem:[%s3014_s1 + $0x28] sm:$0xff]  ;;  %v2699_v14 = vld [vmem:[%s3015_s2 + $0x18] sm:$0xff]  ;;  %v2711_v16 = vld [vmem:[%s3015_s2] sm:$0xff]  ;;  %s244_s27 = sadd.s32 %s2099_s17, %s3032_s10 }
  0x13   : > { %v273_v4 = vld [vmem:[%s2632_s13 + $0x8] sm:$0x3]  ;;  %v272_v5 = vld [vmem:[%s2632_s13] sm:$0xff]  ;;  %449 = vmatpush1.msra.mxu1 %v2699_v14  ;;  %v2143_v21 = vld [vmem:[%s2632_s13 + $0x18] sm:$0xff]  ;;  %s2100_s30 = sshll.u32 %s244_s27, 3 }
  0x14   : > { %2341 = vmatprep.subr.msk.mxu0 %vm293_vm1, %v273_v4  ;;  %v2705_v15 = vld [vmem:[%s3015_s2 + $0x8] sm:$0xff]  ;;  %v2144_v18 = vld [vmem:[%s2632_s13 + $0x20] sm:$0x3]  ;;  %v2187_v26 = vld [vmem:[%s2632_s13 + $0x38] sm:$0x3]  ;;  %s246_s8 = scalar_lea.vmem %s3018_s5, %s2100_s30 }
  0x15   : > { %2342 = vmatpush3.msk.msra.mxu0 %vm293_vm1, %v273_v4  ;;  %450 = vmatprep.subr.mxu1 %v2705_v15  ;;  %v2125_v27 = vld [vmem:[%s3016_s3] ss:$0 sm:$0xff]  ;;  %v2127_v30 = vld [vmem:[%s3016_s3 + $0x1] ss:$0 sm:$0xff]  ;;  %v2129_v37 = vld [vmem:[%s3016_s3 + $0x2] ss:$0 sm:$0xff] }
  0x16   : > { %2343 = vmatprep.subr.mxu0 %v272_v5  ;;  %451 = vmatpush1.msra.mxu1 %v2711_v16  ;;  %v2102_v28 = vld [vmem:[%s3017_s4] ss:$0 sm:$0xff]  ;;  %v2131_v44 = vld [vmem:[%s3016_s3 + $0x3] ss:$0 sm:$0xff]  ;;  %v2133_v49 = vld [vmem:[%s3016_s3 + $0x4] ss:$0 sm:$0xff] }
  0x17   : > { %2344 = vmatpush3.msra.mxu0 %v272_v5  ;;  %2152 = vmatprep.subr.msk.mxu1 %vm293_vm1, %v2610_v1  ;;  %v2135_v59 = vld [vmem:[%s3016_s3 + $0x5] ss:$0 sm:$0xff] }
  0x18   : > { %2346 = vmatmul.mubr.msk.f32.vlgmr.msra.gmra.mxu0 %vm274_vm0, %v2641_v6  ;;  %2354 = vmatprep.subr.msk.mxu0 %vm293_vm1, %v2646_v7 }
  0x19   : > { %2348 = vmatprep.mubr.msk.f32.mxu0 %vm274_vm0, %v2651_v8  ;;  %2355 = vmatpush3.msk.msra.mxu0 %vm293_vm1, %v2646_v7 }
  0x1a   : > { %2356 = vmatprep.subr.mxu0 %v2656_v9 }
  0x1b   : > { %2357 = vmatpush3.msra.mxu0 %v2656_v9 }
  0x1c   : > { %2349 = vmatmul.mubr.msk.f32.gmra.mxu0 %vm274_vm0, %v2667_v10  ;;  %2358 = vmatprep.subr.mxu0 %v2674_v11 }
  0x1d   : > { %2351 = vmatprep.mubr.msk.f32.mxu0 %vm274_vm0, %v2679_v12  ;;  %2359 = vmatpush3.msra.mxu0 %v2674_v11 }
  0x1e   : > { %2369 = vmatprep.subr.msk.mxu0 %vm293_vm1, %v2144_v18 }
  0x20   : > { %2352 = vmatmul.mubr.msk.f32.gmra.mxu0 %vm274_vm0, %v2691_v13 }
  0xd8   : > { %v2347_v19 = vpop.f32.mrf.mxu0 }
  0xda   : > { %v363_v20 = vpop.f32.mrf.mxu0 }
  0xdb   : > { %2112 = vmatmul.mubr.msk.f32.vlgmr.msra.gmra.mxu1 %vm392_vm2, %v363_v20  ;;  %2360 = vmatprep.mubr.msk.f32.mxu0 %vm392_vm2, %v363_v20 }
  0xdc   : > { %v2350_v22 = vpop.f32.mrf.mxu0  ;;  %2361 = vmatmul.mubr.msk.f32.vlgmr.msra.gmra.mxu0 %vm392_vm2, %v2347_v19  ;;  %490 = vmatprep.mubr.f32.mxu1 %v2535_v17 }
  0xdd   : > { %2370 = vmatpush3.msk.msra.mxu0 %vm293_vm1, %v2144_v18  ;;  %2153 = vmatpush1.msk.msra.mxu1 %vm293_vm1, %v2615_v2 }
  0xde   : > { %v373_v23 = vpop.f32.mrf.mxu0  ;;  %2371 = vmatprep.subr.mxu0 %v2143_v21  ;;  %871 = vmatprep.subr.mxu1 %v2620_v3 }
  0xdf   : > { %2113 = vmatmul.mubr.msk.f32.gmra.mxu1 %vm392_vm2, %v2347_v19  ;;  %2363 = vmatprep.mubr.msk.f32.mxu0 %vm392_vm2, %v373_v23  ;;  %v2137_v19 = vld [vmem:[%s3016_s3 + $0x6] ss:$0 sm:$0xff] }
  0xe0   : > { %v2353_v24 = vpop.f32.mrf.mxu0  ;;  %2364 = vmatmul.mubr.msk.f32.gmra.mxu0 %vm392_vm2, %v2350_v22  ;;  %496 = vmatprep.mubr.f32.mxu1 %v2535_v17 }
  0xe1   : > { %2372 = vmatpush3.msra.mxu0 %v2143_v21  ;;  %872 = vmatpush1.msra.mxu1 %v2699_v14 }
  0xe2   : > { %v383_v25 = vpop.f32.mrf.mxu0  ;;  %2382 = vmatprep.subr.msk.mxu0 %vm293_vm1, %v2646_v7  ;;  %873 = vmatprep.subr.mxu1 %v2705_v15 }
  0xe3   : > { %2114 = vmatmul.mubr.msk.f32.gmra.mxu1 %vm392_vm2, %v373_v23  ;;  %2366 = vmatprep.mubr.msk.f32.mxu0 %vm392_vm2, %v383_v25 }
  0xe4   : > { %2367 = vmatmul.mubr.msk.f32.gmra.mxu0 %vm392_vm2, %v2353_v24  ;;  %502 = vmatprep.mubr.f32.mxu1 %v2535_v17 }
  0xe5   : > { %2373 = vmatprep.mubr.msk.f32.mxu0 %vm274_vm0, %v2601_v0  ;;  %874 = vmatpush1.msra.mxu1 %v2711_v16 }
  0xe6   : > { %2195 = vmatprep.subr.msk.mxu1 %vm293_vm1, %v2610_v1 }
  0xe7   : > { %2115 = vmatmul.mubr.msk.f32.gmra.mxu1 %vm392_vm2, %v2350_v22 }
  0xe8   : > { %2374 = vmatmul.mubr.msk.f32.vlgmr.msra.gmra.mxu0 %vm274_vm0, %v2641_v6  ;;  %508 = vmatprep.mubr.f32.mxu1 %v2535_v17 }
  0xe9   : > { %2376 = vmatprep.mubr.msk.f32.mxu0 %vm274_vm0, %v2651_v8  ;;  %2383 = vmatpush3.msk.msra.mxu0 %vm293_vm1, %v2646_v7 }
  0xea   : > { %2384 = vmatprep.subr.mxu0 %v2656_v9 }
  0xeb   : > { %2116 = vmatmul.mubr.msk.f32.gmra.mxu1 %vm392_vm2, %v383_v25  ;;  %2385 = vmatpush3.msra.mxu0 %v2656_v9  ;;  %v2139_v25 = vld [vmem:[%s3016_s3 + $0x7] ss:$0 sm:$0xff] }
  0xec   : > { %2377 = vmatmul.mubr.msk.f32.gmra.mxu0 %vm274_vm0, %v2667_v10  ;;  %514 = vmatprep.mubr.f32.mxu1 %v2535_v17 }
  0xed   : > { %2379 = vmatprep.mubr.msk.f32.mxu0 %vm274_vm0, %v2679_v12  ;;  %2386 = vmatprep.subr.mxu0 %v2674_v11 }
  0xee   : > { %2387 = vmatpush3.msra.mxu0 %v2674_v11 }
  0xef   : > { %2117 = vmatmul.mubr.msk.f32.gmra.mxu1 %vm392_vm2, %v2353_v24  ;;  %2397 = vmatprep.subr.msk.mxu0 %vm293_vm1, %v2187_v26 }
  0xf0   : > { %2380 = vmatmul.mubr.msk.f32.gmra.mxu0 %vm274_vm0, %v2691_v13  ;;  %907 = vmatprep.mubr.f32.mxu1 %v2535_v17 }
 0x19b   : > { %v486_v29 = vpop.f32.mrf.mxu1 }
 0x19c   : > { %v623_v31 = vmul.f32 %v2125_v27, %v486_v29  ;;  %v2362_v32 = vpop.f32.mrf.mxu0 }
 0x19d   : > { %v488_v33 = vpop.f32.mrf.mxu1  ;;  %v648_v55 = vmul.f32 %v2362_v32, %v2129_v37 }
 0x19e   : > { %v625_v34 = vadd.f32 %v2102_v28, %v623_v31  ;;  %v635_v35 = vmul.f32 %v2127_v30, %v488_v33  ;;  %v587_v36 = vpop.f32.mrf.mxu0 }
 0x19f   : > { %v492_v38 = vpop.f32.mrf.mxu1  ;;  %v647_v40 = vmul.f32 %v2129_v37, %v587_v36  ;;  %v2141_v37 = vld [vmem:[%s3016_s3 + $0x8] ss:$0 sm:$0xff] }
 0x1a0   : > { %v637_v39 = vadd.f32 %v635_v35, %v625_v34  ;;  %v624_v41 = vmul.f32 %v2125_v27, %v492_v38  ;;  %v2365_v42 = vpop.f32.mrf.mxu0  ;;  %v2186_v27 = vld [vmem:[%s2632_s13 + $0x30] sm:$0xff] }
 0x1a1   : > { %v494_v43 = vpop.f32.mrf.mxu1 }
 0x1a2   : > { %v626_v45 = vadd.f32 %v2102_v28, %v624_v41  ;;  %v636_v46 = vmul.f32 %v2127_v30, %v494_v43  ;;  %v597_v47 = vpop.f32.mrf.mxu0  ;;  %v649_v50 = vadd.f32 %v647_v40, %v637_v39  ;;  %v684_v28 = vmul.f32 %v2365_v42, %v2135_v59 }
 0x1a3   : > { %v498_v48 = vpop.f32.mrf.mxu1  ;;  %v683_v61 = vmul.f32 %v2135_v59, %v597_v47 }
 0x1a4   : > { %v638_v51 = vadd.f32 %v636_v46, %v626_v45  ;;  %v659_v52 = vmul.f32 %v2131_v44, %v498_v48  ;;  %v2368_v53 = vpop.f32.mrf.mxu0 }
 0x1a5   : > { %v500_v54 = vpop.f32.mrf.mxu1  ;;  %v720_v47 = vmul.f32 %v2368_v53, %v2141_v37 }
 0x1a6   : > { %v661_v56 = vadd.f32 %v659_v52, %v649_v50  ;;  %v671_v57 = vmul.f32 %v2133_v49, %v500_v54  ;;  %v607_v58 = vpop.f32.mrf.mxu0  ;;  %v650_v63 = vadd.f32 %v648_v55, %v638_v51  ;;  %v2168_v50 = vld [vmem:[%s3016_s3 + $0x9] ss:$0 sm:$0xff]  ;;  %v2170_v52 = vld [vmem:[%s3016_s3 + $0xa] ss:$0 sm:$0xff] }
 0x1a7   : > { %v504_v60 = vpop.f32.mrf.mxu1 }
 0x1a8   : > { %v673_v62 = vadd.f32 %v671_v57, %v661_v56  ;;  %v660_v4 = vmul.f32 %v2131_v44, %v504_v60  ;;  %v2375_v5 = vpop.f32.mrf.mxu0  ;;  %v2172_v57 = vld [vmem:[%s3016_s3 + $0xb] ss:$0 sm:$0xff] }
 0x1a9   : > { %v506_v18 = vpop.f32.mrf.mxu1 }
 0x1aa   : > { %v662_v20 = vadd.f32 %v660_v4, %v650_v63  ;;  %v672_v21 = vmul.f32 %v2133_v49, %v506_v18  ;;  %v796_v22 = vpop.f32.mrf.mxu0  ;;  %v685_v23 = vadd.f32 %v683_v61, %v673_v62  ;;  %v2174_v18 = vld [vmem:[%s3016_s3 + $0xc] ss:$0 sm:$0xff] }
 0x1ab   : > { %v510_v24 = vpop.f32.mrf.mxu1  ;;  %2154 = vmatmul.mubr.msk.f32.vlgmr.msra.gmra.mxu1 %vm392_vm2, %v796_v22  ;;  %2388 = vmatprep.mubr.msk.f32.mxu0 %vm392_vm2, %v796_v22 }
 0x1ac   : > { %v674_v29 = vadd.f32 %v672_v21, %v662_v20  ;;  %v695_v30 = vmul.f32 %v2137_v19, %v510_v24  ;;  %v2378_v31 = vpop.f32.mrf.mxu0  ;;  %2389 = vmatmul.mubr.msk.f32.vlgmr.msra.gmra.mxu0 %vm392_vm2, %v2375_v5  ;;  %913 = vmatprep.mubr.f32.mxu1 %v2535_v17  ;;  %v2176_v24 = vld [vmem:[%s3016_s3 + $0xd] ss:$0 sm:$0xff] }
 0x1ad   : > { %2398 = vmatpush3.msk.msra.mxu0 %vm293_vm1, %v2187_v26  ;;  %v512_v32 = vpop.f32.mrf.mxu1  ;;  %2196 = vmatpush1.msk.msra.mxu1 %vm293_vm1, %v2615_v2  ;;  %v719_v26 = vmul.f32 %v2141_v37, %v607_v58 }
 0x1ae   : > { %v697_v33 = vadd.f32 %v695_v30, %v685_v23  ;;  %v707_v34 = vmul.f32 %v2139_v25, %v512_v32  ;;  %v806_v35 = vpop.f32.mrf.mxu0  ;;  %v686_v36 = vadd.f32 %v684_v28, %v674_v29  ;;  %2399 = vmatprep.subr.mxu0 %v2186_v27  ;;  %1295 = vmatprep.subr.mxu1 %v2620_v3 }
 0x1af   : > { %v516_v38 = vpop.f32.mrf.mxu1  ;;  %2155 = vmatmul.mubr.msk.f32.gmra.mxu1 %vm392_vm2, %v2375_v5  ;;  %2391 = vmatprep.mubr.msk.f32.mxu0 %vm392_vm2, %v806_v35 }
 0x1b0   : > { %v709_v39 = vadd.f32 %v707_v34, %v697_v33  ;;  %v696_v40 = vmul.f32 %v2137_v19, %v516_v38  ;;  %v2381_v41 = vpop.f32.mrf.mxu0  ;;  %2392 = vmatmul.mubr.msk.f32.gmra.mxu0 %vm392_vm2, %v2378_v31  ;;  %919 = vmatprep.mubr.f32.mxu1 %v2535_v17 }
 0x1b1   : > { %v518_v42 = vpop.f32.mrf.mxu1  ;;  %2400 = vmatpush3.msra.mxu0 %v2186_v27  ;;  %1296 = vmatpush1.msra.mxu1 %v2699_v14 }
 0x1b2   : > { %v698_v43 = vadd.f32 %v696_v40, %v686_v36  ;;  %v708_v44 = vmul.f32 %v2139_v25, %v518_v42  ;;  %v816_v45 = vpop.f32.mrf.mxu0  ;;  %v721_v46 = vadd.f32 %v719_v26, %v709_v39  ;;  %2410 = vmatprep.subr.msk.mxu0 %vm293_vm1, %v2646_v7  ;;  %1297 = vmatprep.subr.mxu1 %v2705_v15 }
 0x1b3   : > { %2156 = vmatmul.mubr.msk.f32.gmra.mxu1 %vm392_vm2, %v806_v35  ;;  %2394 = vmatprep.mubr.msk.f32.mxu0 %vm392_vm2, %v816_v45  ;;  %v2178_v35 = vld [vmem:[%s3016_s3 + $0xe] ss:$0 sm:$0xff] }
 0x1b4   : > { %v710_v48 = vadd.f32 %v708_v44, %v698_v43  ;;  %2395 = vmatmul.mubr.msk.f32.gmra.mxu0 %vm392_vm2, %v2381_v41  ;;  %925 = vmatprep.mubr.f32.mxu1 %v2535_v17 }
 0x1b5   : > { %2401 = vmatprep.mubr.msk.f32.mxu0 %vm274_vm0, %v2601_v0  ;;  %1298 = vmatpush1.msra.mxu1 %v2711_v16 }
 0x1b6   : > { %v722_v49 = vadd.f32 %v720_v47, %v710_v48  ;;  %2238 = vmatprep.subr.msk.mxu1 %vm293_vm1, %v2610_v1  ;;  %v2230_v1 = vld [vmem:[%s2632_s13 + $0x50] sm:$0x3]  ;;  %v2229_v48 = vld [vmem:[%s2632_s13 + $0x48] sm:$0xff] }
 0x1b7   : > { %2157 = vmatmul.mubr.msk.f32.gmra.mxu1 %vm392_vm2, %v2378_v31  ;;  %v2182_v47 = vld [vmem:[%s3016_s3 + $0x10] ss:$0 sm:$0xff] }
 0x1b8   : > { %2402 = vmatmul.mubr.msk.f32.vlgmr.msra.gmra.mxu0 %vm274_vm0, %v2641_v6  ;;  %931 = vmatprep.mubr.f32.mxu1 %v2535_v17 }
 0x1b9   : > { %2404 = vmatprep.mubr.msk.f32.mxu0 %vm274_vm0, %v2651_v8  ;;  %2411 = vmatpush3.msk.msra.mxu0 %vm293_vm1, %v2646_v7 }
 0x1ba   : > { %2412 = vmatprep.subr.mxu0 %v2656_v9 }
 0x1bb   : > { %2158 = vmatmul.mubr.msk.f32.gmra.mxu1 %vm392_vm2, %v816_v45  ;;  %2413 = vmatpush3.msra.mxu0 %v2656_v9 }
 0x1bc   : > { %2405 = vmatmul.mubr.msk.f32.gmra.mxu0 %vm274_vm0, %v2667_v10  ;;  %937 = vmatprep.mubr.f32.mxu1 %v2535_v17 }
 0x1bd   : > { %2407 = vmatprep.mubr.msk.f32.mxu0 %vm274_vm0, %v2679_v12  ;;  %2414 = vmatprep.subr.mxu0 %v2674_v11 }
 0x1be   : > { %2415 = vmatpush3.msra.mxu0 %v2674_v11 }
 0x1bf   : > { %2159 = vmatmul.mubr.msk.f32.gmra.mxu1 %vm392_vm2, %v2381_v41  ;;  %2425 = vmatprep.subr.msk.mxu0 %vm293_vm1, %v2230_v1  ;;  %v2180_v41 = vld [vmem:[%s3016_s3 + $0xf] ss:$0 sm:$0xff] }
 0x1c0   : > { %2408 = vmatmul.mubr.msk.f32.gmra.mxu0 %vm274_vm0, %v2691_v13  ;;  %1331 = vmatprep.mubr.f32.mxu1 %v2535_v17 }
 0x26b   : > { %v909_v51 = vpop.f32.mrf.mxu1 }
 0x26c   : > { %v1047_v53 = vmul.f32 %v2168_v50, %v909_v51  ;;  %v2390_v54 = vpop.f32.mrf.mxu0 }
 0x26d   : > { %v911_v55 = vpop.f32.mrf.mxu1  ;;  %v1072_v25 = vmul.f32 %v2390_v54, %v2172_v57 }
 0x26e   : > { %v1049_v56 = vadd.f32 %v1047_v53, %v721_v46  ;;  %v1059_v58 = vmul.f32 %v2170_v52, %v911_v55  ;;  %v1010_v59 = vpop.f32.mrf.mxu0 }
 0x26f   : > { %v1071_v60 = vmul.f32 %v2172_v57, %v1010_v59  ;;  %v915_v61 = vpop.f32.mrf.mxu1 }
 0x270   : > { %v1061_v62 = vadd.f32 %v1059_v58, %v1049_v56  ;;  %v1048_v63 = vmul.f32 %v2168_v50, %v915_v61  ;;  %v2393_v4 = vpop.f32.mrf.mxu0  ;;  %v2184_v58 = vld [vmem:[%s3016_s3 + $0x11] ss:$0 sm:$0xff] }
 0x271   : > { %v917_v5 = vpop.f32.mrf.mxu1 }
 0x272   : > { %v1073_v19 = vadd.f32 %v1071_v60, %v1061_v62  ;;  %v1050_v20 = vadd.f32 %v1048_v63, %v722_v49  ;;  %v1060_v21 = vmul.f32 %v2170_v52, %v917_v5  ;;  %v1020_v22 = vpop.f32.mrf.mxu0  ;;  %v1108_v49 = vmul.f32 %v2393_v4, %v2178_v35 }
 0x273   : > { %v921_v23 = vpop.f32.mrf.mxu1  ;;  %v1107_v37 = vmul.f32 %v2178_v35, %v1020_v22 }
 0x274   : > { %v1062_v27 = vadd.f32 %v1060_v21, %v1050_v20  ;;  %v1083_v28 = vmul.f32 %v2174_v18, %v921_v23  ;;  %v2396_v29 = vpop.f32.mrf.mxu0 }
 0x275   : > { %v923_v30 = vpop.f32.mrf.mxu1 }
 0x276   : > { %v1085_v31 = vadd.f32 %v1083_v28, %v1073_v19  ;;  %v1095_v32 = vmul.f32 %v2176_v24, %v923_v30  ;;  %v1030_v33 = vpop.f32.mrf.mxu0  ;;  %v1074_v34 = vadd.f32 %v1072_v25, %v1062_v27  ;;  %v2217_v25 = vld [vmem:[%s3016_s3 + $0x15] ss:$0 sm:$0xff] }
 0x277   : > { %v927_v36 = vpop.f32.mrf.mxu1 }
 0x278   : > { %v1097_v38 = vadd.f32 %v1095_v32, %v1085_v31  ;;  %v1084_v26 = vmul.f32 %v2174_v18, %v927_v36  ;;  %v2403_v39 = vpop.f32.mrf.mxu0  ;;  %v1144_v18 = vmul.f32 %v2396_v29, %v2184_v58  ;;  %v2219_v32 = vld [vmem:[%s3016_s3 + $0x16] ss:$0 sm:$0xff] }
 0x279   : > { %v929_v40 = vpop.f32.mrf.mxu1 }
 0x27a   : > { %v1086_v42 = vadd.f32 %v1084_v26, %v1074_v34  ;;  %v1096_v43 = vmul.f32 %v2176_v24, %v929_v40  ;;  %v1220_v44 = vpop.f32.mrf.mxu0  ;;  %v1109_v45 = vadd.f32 %v1107_v37, %v1097_v38 }
 0x27b   : > { %v933_v46 = vpop.f32.mrf.mxu1  ;;  %2197 = vmatmul.mubr.msk.f32.vlgmr.msra.gmra.mxu1 %vm392_vm2, %v1220_v44  ;;  %2416 = vmatprep.mubr.msk.f32.mxu0 %vm392_vm2, %v1220_v44 }
 0x27c   : > { %v1098_v50 = vadd.f32 %v1096_v43, %v1086_v42  ;;  %v1119_v51 = vmul.f32 %v2180_v41, %v933_v46  ;;  %v2406_v52 = vpop.f32.mrf.mxu0  ;;  %2417 = vmatmul.mubr.msk.f32.vlgmr.msra.gmra.mxu0 %vm392_vm2, %v2403_v39  ;;  %1337 = vmatprep.mubr.f32.mxu1 %v2535_v17 }
 0x27d   : > { %2426 = vmatpush3.msk.msra.mxu0 %vm293_vm1, %v2230_v1  ;;  %v935_v53 = vpop.f32.mrf.mxu1  ;;  %2239 = vmatpush1.msk.msra.mxu1 %vm293_vm1, %v2615_v2  ;;  %v1143_v1 = vmul.f32 %v2184_v58, %v1030_v33 }
 0x27e   : > { %v1121_v54 = vadd.f32 %v1119_v51, %v1109_v45  ;;  %v1131_v55 = vmul.f32 %v2182_v47, %v935_v53  ;;  %v1230_v56 = vpop.f32.mrf.mxu0  ;;  %v1110_v57 = vadd.f32 %v1108_v49, %v1098_v50  ;;  %2427 = vmatprep.subr.mxu0 %v2229_v48  ;;  %1719 = vmatprep.subr.mxu1 %v2620_v3 }
 0x27f   : > { %v939_v59 = vpop.f32.mrf.mxu1  ;;  %2198 = vmatmul.mubr.msk.f32.gmra.mxu1 %vm392_vm2, %v2403_v39  ;;  %2419 = vmatprep.mubr.msk.f32.mxu0 %vm392_vm2, %v1230_v56 }
 0x280   : > { %v1133_v60 = vadd.f32 %v1131_v55, %v1121_v54  ;;  %v1120_v61 = vmul.f32 %v2180_v41, %v939_v59  ;;  %v2409_v2 = vpop.f32.mrf.mxu0  ;;  %2420 = vmatmul.mubr.msk.f32.gmra.mxu0 %vm392_vm2, %v2406_v52  ;;  %1343 = vmatprep.mubr.f32.mxu1 %v2535_v17  ;;  %v2221_v41 = vld [vmem:[%s3016_s3 + $0x17] ss:$0 sm:$0xff]  ;;  %v2225_v54 = vld [vmem:[%s3016_s3 + $0x19] ss:$0 sm:$0xff] }
 0x281   : > { %v941_v62 = vpop.f32.mrf.mxu1  ;;  %2428 = vmatpush3.msra.mxu0 %v2229_v48  ;;  %1720 = vmatpush1.msra.mxu1 %v2699_v14  ;;  %v2223_v48 = vld [vmem:[%s3016_s3 + $0x18] ss:$0 sm:$0xff] }
 0x282   : > { %v1122_v3 = vadd.f32 %v1120_v61, %v1110_v57  ;;  %v1132_v63 = vmul.f32 %v2182_v47, %v941_v62  ;;  %v1240_v4 = vpop.f32.mrf.mxu0  ;;  %v1145_v5 = vadd.f32 %v1143_v1, %v1133_v60  ;;  %1721 = vmatprep.subr.mxu1 %v2705_v15  ;;  %2438 = vmatprep.subr.msk.mxu0 %vm293_vm1, %v2646_v7  ;;  %v2227_v62 = vld [vmem:[%s3016_s3 + $0x1a] ss:$0 sm:$0xff] }
 0x283   : > { %2199 = vmatmul.mubr.msk.f32.gmra.mxu1 %vm392_vm2, %v1230_v56  ;;  %2422 = vmatprep.mubr.msk.f32.mxu0 %vm392_vm2, %v1240_v4 }
 0x284   : > { %v1134_v19 = vadd.f32 %v1132_v63, %v1122_v3  ;;  %2423 = vmatmul.mubr.msk.f32.gmra.mxu0 %vm392_vm2, %v2409_v2  ;;  %1349 = vmatprep.mubr.f32.mxu1 %v2535_v17 }
 0x285   : > { %2429 = vmatprep.mubr.msk.f32.mxu0 %vm274_vm0, %v2601_v0  ;;  %1722 = vmatpush1.msra.mxu1 %v2711_v16  ;;  %v2211_v0 = vld [vmem:[%s3016_s3 + $0x12] ss:$0 sm:$0xff] }
 0x286   : > { %v1146_v14 = vadd.f32 %v1144_v18, %v1134_v19 }
 0x287   : > { %2200 = vmatmul.mubr.msk.f32.gmra.mxu1 %vm392_vm2, %v2406_v52 }
 0x288   : > { %2430 = vmatmul.mubr.msk.f32.vlgmr.msra.gmra.mxu0 %vm274_vm0, %v2641_v6  ;;  %1355 = vmatprep.mubr.f32.mxu1 %v2535_v17 }
 0x289   : > { %2432 = vmatprep.mubr.msk.f32.mxu0 %vm274_vm0, %v2651_v8  ;;  %2439 = vmatpush3.msk.msra.mxu0 %vm293_vm1, %v2646_v7  ;;  %v2213_v7 = vld [vmem:[%s3016_s3 + $0x13] ss:$0 sm:$0xff] }
 0x28a   : > { %2440 = vmatprep.subr.mxu0 %v2656_v9 }
 0x28b   : > { %2201 = vmatmul.mubr.msk.f32.gmra.mxu1 %vm392_vm2, %v1240_v4  ;;  %2441 = vmatpush3.msra.mxu0 %v2656_v9 }
 0x28c   : > { %2433 = vmatmul.mubr.msk.f32.gmra.mxu0 %vm274_vm0, %v2667_v10  ;;  %1361 = vmatprep.mubr.f32.mxu1 %v2535_v17 }
 0x28d   : > { %2435 = vmatprep.mubr.msk.f32.mxu0 %vm274_vm0, %v2679_v12  ;;  %2442 = vmatprep.subr.mxu0 %v2674_v11  ;;  %v2215_v12 = vld [vmem:[%s3016_s3 + $0x14] ss:$0 sm:$0xff] }
 0x28e   : > { %2443 = vmatpush3.msra.mxu0 %v2674_v11 }
 0x28f   : > { %2202 = vmatmul.mubr.msk.f32.gmra.mxu1 %vm392_vm2, %v2409_v2 }
 0x290   : > { %2436 = vmatmul.mubr.msk.f32.gmra.mxu0 %vm274_vm0, %v2691_v13  ;;  %1755 = vmatprep.mubr.f32.mxu1 %v2535_v17 }
 0x33b   : > { %v1333_v6 = vpop.f32.mrf.mxu1 }
 0x33c   : > { %v1471_v8 = vmul.f32 %v2211_v0, %v1333_v6  ;;  %v2418_v9 = vpop.f32.mrf.mxu0 }
 0x33d   : > { %v1335_v10 = vpop.f32.mrf.mxu1  ;;  %v1496_v33 = vmul.f32 %v2418_v9, %v2215_v12 }
 0x33e   : > { %v1473_v11 = vadd.f32 %v1471_v8, %v1145_v5  ;;  %v1483_v13 = vmul.f32 %v2213_v7, %v1335_v10  ;;  %v1434_v15 = vpop.f32.mrf.mxu0 }
 0x33f   : > { %v1495_v16 = vmul.f32 %v2215_v12, %v1434_v15  ;;  %v1339_v20 = vpop.f32.mrf.mxu1 }
 0x340   : > { %v1485_v21 = vadd.f32 %v1483_v13, %v1473_v11  ;;  %v1472_v22 = vmul.f32 %v2211_v0, %v1339_v20  ;;  %v2421_v23 = vpop.f32.mrf.mxu0  ;;  %v2254_v11 = vld [vmem:[%s3016_s3 + $0x1b] ss:$0 sm:$0xff]  ;;  %v2256_v13 = vld [vmem:[%s3016_s3 + $0x1c] ss:$0 sm:$0xff] }
 0x341   : > { %v1341_v24 = vpop.f32.mrf.mxu1  ;;  %v1532_v55 = vmul.f32 %v2421_v23, %v2221_v41 }
 0x342   : > { %v1497_v27 = vadd.f32 %v1495_v16, %v1485_v21  ;;  %v1474_v28 = vadd.f32 %v1472_v22, %v1146_v14  ;;  %v1484_v29 = vmul.f32 %v2213_v7, %v1341_v24  ;;  %v1444_v30 = vpop.f32.mrf.mxu0 }
 0x343   : > { %v1345_v31 = vpop.f32.mrf.mxu1  ;;  %v1531_v43 = vmul.f32 %v2221_v41, %v1444_v30  ;;  %v2260_v30 = vld [vmem:[%s3016_s3 + $0x1e] ss:$0 sm:$0xff] }
 0x344   : > { %v1486_v34 = vadd.f32 %v1484_v29, %v1474_v28  ;;  %v1507_v35 = vmul.f32 %v2217_v25, %v1345_v31  ;;  %v2424_v36 = vpop.f32.mrf.mxu0 }
 0x345   : > { %v1347_v37 = vpop.f32.mrf.mxu1  ;;  %v1568_v8 = vmul.f32 %v2424_v36, %v2227_v62 }
 0x346   : > { %v1509_v38 = vadd.f32 %v1507_v35, %v1497_v27  ;;  %v1519_v26 = vmul.f32 %v2219_v32, %v1347_v37  ;;  %v1454_v39 = vpop.f32.mrf.mxu0  ;;  %v1498_v40 = vadd.f32 %v1496_v33, %v1486_v34  ;;  %v2262_v35 = vld [vmem:[%s3016_s3 + $0x1f] ss:$0 sm:$0xff] }
 0x347   : > { %v1351_v42 = vpop.f32.mrf.mxu1  ;;  %v1567_v63 = vmul.f32 %v2227_v62, %v1454_v39 }
 0x348   : > { %v1521_v44 = vadd.f32 %v1519_v26, %v1509_v38  ;;  %v1508_v45 = vmul.f32 %v2217_v25, %v1351_v42  ;;  %v2431_v46 = vpop.f32.mrf.mxu0  ;;  %v2264_v42 = vld [vmem:[%s3016_s3 + $0x20] ss:$0 sm:$0xff] }
 0x349   : > { %v1353_v47 = vpop.f32.mrf.mxu1 }
 0x34a   : > { %v1510_v49 = vadd.f32 %v1508_v45, %v1498_v40  ;;  %v1520_v50 = vmul.f32 %v2219_v32, %v1353_v47  ;;  %v1644_v51 = vpop.f32.mrf.mxu0  ;;  %v1533_v52 = vadd.f32 %v1531_v43, %v1521_v44 }
 0x34b   : > { %v1357_v53 = vpop.f32.mrf.mxu1  ;;  %2240 = vmatmul.mubr.msk.f32.vlgmr.msra.gmra.mxu1 %vm392_vm2, %v1644_v51  ;;  %2444 = vmatprep.mubr.msk.f32.mxu0 %vm392_vm2, %v1644_v51 }
 0x34c   : > { %v1522_v56 = vadd.f32 %v1520_v50, %v1510_v49  ;;  %v1543_v57 = vmul.f32 %v2223_v48, %v1357_v53  ;;  %v2434_v58 = vpop.f32.mrf.mxu0  ;;  %2445 = vmatmul.mubr.msk.f32.vlgmr.msra.gmra.mxu0 %vm392_vm2, %v2431_v46  ;;  %1761 = vmatprep.mubr.f32.mxu1 %v2535_v17  ;;  %v2266_v50 = vld [vmem:[%s3016_s3 + $0x21] ss:$0 sm:$0xff] }
 0x34d   : > { %v1359_v59 = vpop.f32.mrf.mxu1 }
 0x34e   : > { %v1545_v1 = vadd.f32 %v1543_v57, %v1533_v52  ;;  %v1555_v60 = vmul.f32 %v2225_v54, %v1359_v59  ;;  %v1654_v61 = vpop.f32.mrf.mxu0  ;;  %v1534_v2 = vadd.f32 %v1532_v55, %v1522_v56  ;;  %v2268_v55 = vld [vmem:[%s3016_s3 + $0x22] ss:$0 sm:$0xff]  ;;  %v2270_v59 = vld [vmem:[%s3016_s3 + $0x23] ss:$0 sm:$0xff] }
 0x34f   : > { %v1363_v3 = vpop.f32.mrf.mxu1  ;;  %2241 = vmatmul.mubr.msk.f32.gmra.mxu1 %vm392_vm2, %v2431_v46  ;;  %2447 = vmatprep.mubr.msk.f32.mxu0 %vm392_vm2, %v1654_v61 }
 0x350   : > { %v1557_v4 = vadd.f32 %v1555_v60, %v1545_v1  ;;  %v1544_v5 = vmul.f32 %v2223_v48, %v1363_v3  ;;  %2448 = vmatmul.mubr.msk.f32.gmra.mxu0 %vm392_vm2, %v2434_v58  ;;  %1767 = vmatprep.mubr.f32.mxu1 %v2535_v17  ;;  %v2437_v18 = vpop.f32.mrf.mxu0 }
 0x351   : > { %v1365_v19 = vpop.f32.mrf.mxu1 }
 0x352   : > { %v1546_v14 = vadd.f32 %v1544_v5, %v1534_v2  ;;  %v1556_v0 = vmul.f32 %v2225_v54, %v1365_v19  ;;  %v1664_v6 = vpop.f32.mrf.mxu0  ;;  %v1569_v7 = vadd.f32 %v1567_v63, %v1557_v4 }
 0x353   : > { %2242 = vmatmul.mubr.msk.f32.gmra.mxu1 %vm392_vm2, %v1654_v61  ;;  %2450 = vmatprep.mubr.msk.f32.mxu0 %vm392_vm2, %v1664_v6 }
 0x354   : > { %v1558_v9 = vadd.f32 %v1556_v0, %v1546_v14  ;;  %1773 = vmatprep.mubr.f32.mxu1 %v2535_v17  ;;  %2451 = vmatmul.mubr.msk.f32.gmra.mxu0 %vm392_vm2, %v2437_v18 }
 0x356   : > { %v1570_v10 = vadd.f32 %v1568_v8, %v1558_v9 }
 0x357   : > { %2243 = vmatmul.mubr.msk.f32.gmra.mxu1 %vm392_vm2, %v2434_v58 }
 0x358   : > { %1779 = vmatprep.mubr.f32.mxu1 %v2535_v17 }
 0x35b   : > { %2244 = vmatmul.mubr.msk.f32.gmra.mxu1 %vm392_vm2, %v1664_v6 }
 0x35c   : > { %1785 = vmatprep.mubr.f32.mxu1 %v2535_v17  ;;  %v2258_v17 = vld [vmem:[%s3016_s3 + $0x1d] ss:$0 sm:$0xff] }
 0x35f   : > { %2245 = vmatmul.mubr.msk.f32.gmra.mxu1 %vm392_vm2, %v2437_v18 }
 0x40b   : > { %v1757_v12 = vpop.f32.mrf.mxu1 }
 0x40c   : > { %v1895_v15 = vmul.f32 %v2254_v11, %v1757_v12  ;;  %v2446_v16 = vpop.f32.mrf.mxu0 }
 0x40d   : > { %v1759_v20 = vpop.f32.mrf.mxu1  ;;  %v1920_v39 = vmul.f32 %v2446_v16, %v2258_v17 }
 0x40e   : > { %v1897_v21 = vadd.f32 %v1895_v15, %v1569_v7  ;;  %v1907_v22 = vmul.f32 %v2256_v13, %v1759_v20  ;;  %v1858_v23 = vpop.f32.mrf.mxu0 }
 0x40f   : > { %v1763_v24 = vpop.f32.mrf.mxu1  ;;  %v1919_v27 = vmul.f32 %v2258_v17, %v1858_v23 }
 0x410   : > { %v1909_v25 = vadd.f32 %v1907_v22, %v1897_v21  ;;  %v1896_v28 = vmul.f32 %v2254_v11, %v1763_v24  ;;  %v2449_v33 = vpop.f32.mrf.mxu0 }
 0x411   : > { %v1765_v29 = vpop.f32.mrf.mxu1  ;;  %v1956_v61 = vmul.f32 %v2449_v33, %v2264_v42 }
 0x412   : > { %v1898_v31 = vadd.f32 %v1896_v28, %v1570_v10  ;;  %v1908_v32 = vmul.f32 %v2256_v13, %v1765_v29  ;;  %v1921_v36 = vadd.f32 %v1919_v27, %v1909_v25  ;;  %v1868_v43 = vpop.f32.mrf.mxu0 }
 0x413   : > { %v1769_v34 = vpop.f32.mrf.mxu1  ;;  %v1955_v51 = vmul.f32 %v2264_v42, %v1868_v43 }
 0x414   : > { %v1910_v37 = vadd.f32 %v1908_v32, %v1898_v31  ;;  %v1931_v38 = vmul.f32 %v2260_v30, %v1769_v34  ;;  %v2452_v48 = vpop.f32.mrf.mxu0 }
 0x415   : > { %v1771_v26 = vpop.f32.mrf.mxu1  ;;  %v1992_v7 = vmul.f32 %v2452_v48, %v2270_v59 }
 0x416   : > { %v1933_v40 = vadd.f32 %v1931_v38, %v1921_v36  ;;  %v1943_v41 = vmul.f32 %v2262_v35, %v1771_v26  ;;  %v1922_v46 = vadd.f32 %v1920_v39, %v1910_v37  ;;  %v1878_v1 = vpop.f32.mrf.mxu0 }
 0x417   : > { %v1775_v44 = vpop.f32.mrf.mxu1  ;;  %v1991_v63 = vmul.f32 %v2270_v59, %v1878_v1 }
 0x418   : > { %v1945_v45 = vadd.f32 %v1943_v41, %v1933_v40  ;;  %v1932_v47 = vmul.f32 %v2260_v30, %v1775_v44 }
 0x419   : > { %v1777_v49 = vpop.f32.mrf.mxu1 }
 0x41a   : > { %v1934_v52 = vadd.f32 %v1932_v47, %v1922_v46  ;;  %v1944_v53 = vmul.f32 %v2262_v35, %v1777_v49  ;;  %v1957_v57 = vadd.f32 %v1955_v51, %v1945_v45 }
 0x41b   : > { %v1781_v54 = vpop.f32.mrf.mxu1 }
 0x41c   : > { %v1946_v56 = vadd.f32 %v1944_v53, %v1934_v52  ;;  %v1967_v58 = vmul.f32 %v2266_v50, %v1781_v54 }
 0x41d   : > { %v1783_v60 = vpop.f32.mrf.mxu1 }
 0x41e   : > { %v1969_v2 = vadd.f32 %v1967_v58, %v1957_v57  ;;  %v1979_v62 = vmul.f32 %v2268_v55, %v1783_v60  ;;  %v1958_v5 = vadd.f32 %v1956_v61, %v1946_v56 }
 0x41f   : > { %v1787_v3 = vpop.f32.mrf.mxu1 }
 0x420   : > { %v1981_v4 = vadd.f32 %v1979_v62, %v1969_v2  ;;  %v1968_v18 = vmul.f32 %v2266_v50, %v1787_v3 }
 0x421   : > { %v1789_v19 = vpop.f32.mrf.mxu1 }
 0x422   : > { %v1993_v14 = vadd.f32 %v1991_v63, %v1981_v4  ;;  %v1970_v0 = vadd.f32 %v1968_v18, %v1958_v5  ;;  %v1980_v6 = vmul.f32 %v2268_v55, %v1789_v19 }
 0x424   : > { %1995 = vst [vmem:[%s246_s8] sm:$0xff] %v1993_v14  ;;  %v1982_v8 = vadd.f32 %v1980_v6, %v1970_v0 }
 0x426   : > { %v1994_v9 = vadd.f32 %v1992_v7, %v1982_v8 }
 0x428   : > { %1996 = vst [vmem:[%s246_s8 + $0x8] sm:$0xff] %v1994_v9 }
 0x429 PF: > { %s15_s22 = sadd.s32 1, %s2533_s22   ;;  %s3019_s18 = smov %s2525_s20 }
 0x42a   : > { %p12_p7 = scmp.ge.s32.totalorder %s15_s22, 6   ;;  %s3020_s19 = smov %s2529_s21 }
 0x42b   : > { %s3021_s20 = smov %s3024_s23  ;;  %s3022_s21 = smov %s3028_s24 }
 0x42c   :  { %14 = sbr.rel (!%p12_p7) target bundleno = 3 (0x3), region = 109 }

</bundles_post_ra>
